<compile_context>
chip_gen: v5e
topology: v5e:2x2
jax: 0.10.0
libtpu: 0.0.40
codegen_flags: <defaults>
</compile_context>

<pallas_src>
import jax
import jax.numpy as jnp
from jax.experimental import pallas as pl
from jax.experimental.pallas import tpu as pltpu

LANE = 128      # vreg lane width  — last-dim alignment target (hidden dim only)
SUBLANE = 8     # vreg sublane cnt — second-to-last-dim alignment target
MAX_TB = 4096   # batch-tile cap: keeps double-buffered tiles tiny vs v7x VMEM


def _round_up(n: int, m: int) -> int:
    return ((n + m - 1) // m) * m


def _num_tensorcores() -> int:
    """1 TensorCore per chip on v5e/v6e, 2 on v7x.  Pure-Python probe, safe fallback."""
    try:
        kind = (getattr(jax.devices()[0], "device_kind", "") or "").lower()
        if "v7" in kind or "7x" in kind:
            return 2
    except Exception:
        pass
    return 1


def mlp_kernel(x_ref, w1_ref, b1_ref, w2_ref, b2_ref, o_ref):
    # fc1: (tb, D_in) @ (D_in, H_p) + (1, H_p)  -> ReLU
    h = jnp.dot(x_ref[...], w1_ref[...], preferred_element_type=jnp.float32)
    h = h + b1_ref[...]                       # broadcast (1, H_p) over batch rows
    h = jnp.maximum(h, 0.0)                   # ReLU
    # fc2: (tb, H_p) @ (H_p, D_out) + (1, D_out)
    # padded W2 rows are zero, so padded hidden lanes contribute nothing.
    out = jnp.dot(h, w2_ref[...], preferred_element_type=jnp.float32)
    out = out + b2_ref[...]
    o_ref[...] = out.astype(o_ref.dtype)


def prepare_params(w1, b1, w2, b2):
    """Pad the hidden dim to a multiple of 128 ONCE (hoisted out of the forward path).

    w1: (D_in, H), b1: (1, H), w2: (H, D_out), b2: (1, D_out)
    """
    D_in, H = w1.shape
    D_out = w2.shape[1]
    H_p = _round_up(H, LANE)
    w1_p = jnp.zeros((D_in, H_p), w1.dtype).at[:, :H].set(w1)
    b1_p = jnp.zeros((1, H_p), b1.dtype).at[:, :H].set(b1)
    w2_p = jnp.zeros((H_p, D_out), w2.dtype).at[:H, :].set(w2)
    b2_p = b2.reshape(1, D_out)
    return w1_p, b1_p, w2_p, b2_p


def neural_network_forward(x, w1_p, b1_p, w2_p, b2_p, *, n_tiles: int | None = None):
    """Pallas forward for the two-layer MLP (fc1 -> ReLU -> fc2).

    x    : (B, D_in) float32
    w1_p : (D_in, H_p), b1_p: (1, H_p)        (hidden dim pre-padded to 128k)
    w2_p : (H_p, D_out), b2_p: (1, D_out)
    returns (B, D_out) float32
    """
    B, D_in = x.shape
    H_p = w1_p.shape[1]
    D_out = w2_p.shape[1]

    # --- batch tiling derived from B: one tile per TensorCore, <=7 pad rows/tile ---
    if n_tiles is None:
        n_tiles = _num_tensorcores()
    n_tiles = max(1, min(int(n_tiles), pl.cdiv(B, SUBLANE)))
    tb = _round_up(pl.cdiv(B, n_tiles), SUBLANE)
    if tb > MAX_TB:                               # only kicks in for huge batches
        n_tiles = pl.cdiv(B, MAX_TB)
        tb = _round_up(pl.cdiv(B, n_tiles), SUBLANE)
    B_p = n_tiles * tb

    x_p = x if B_p == B else jnp.zeros((B_p, D_in), x.dtype).at[:B].set(x)

    bytes_accessed = (
        x_p.size * x_p.dtype.itemsize
        + w1_p.size * w1_p.dtype.itemsize + b1_p.size * b1_p.dtype.itemsize
        + w2_p.size * w2_p.dtype.itemsize + b2_p.size * b2_p.dtype.itemsize
        + B_p * D_out * 4
    )
    cost = pl.CostEstimate(
        flops=2 * B_p * (D_in * H_p + H_p * D_out),
        transcendentals=0,
        bytes_accessed=bytes_accessed,
    )

    out_p = pl.pallas_call(
        mlp_kernel,
        out_shape=jax.ShapeDtypeStruct((B_p, D_out), jnp.float32),
        grid_spec=pltpu.PrefetchScalarGridSpec(
            num_scalar_prefetch=0,
            grid=(n_tiles,),
            in_specs=[
                # streaming operand: one batch tile per grid step (full D_in lane dim)
                pl.BlockSpec((tb, D_in), lambda i: (i, 0)),
                # weights/biases: same block every step -> stay VMEM-resident
                pl.BlockSpec((D_in, H_p), lambda i: (0, 0)),
                pl.BlockSpec((1, H_p), lambda i: (0, 0)),
                pl.BlockSpec((H_p, D_out), lambda i: (0, 0)),
                pl.BlockSpec((1, D_out), lambda i: (0, 0)),
            ],
            out_specs=pl.BlockSpec((tb, D_out), lambda i: (i, 0)),
        ),
        compiler_params=pltpu.CompilerParams(
            dimension_semantics=("parallel",),    # batch tiles are independent
        ),
        cost_estimate=cost,
    )(x_p, w1_p, b1_p, w2_p, b2_p)

    return out_p if B_p == B else out_p[:B]


def init_params(key, input_size, hidden_size, output_size):
    """Deterministic init mimicking torch.nn.Linear (uniform(-1/sqrt(fan_in), +))."""
    k1, k2, k3, k4 = jax.random.split(key, 4)
    bound1 = 1.0 / jnp.sqrt(jnp.float32(input_size))
    bound2 = 1.0 / jnp.sqrt(jnp.float32(hidden_size))
    w1 = jax.random.uniform(k1, (input_size, hidden_size), jnp.float32, -bound1, bound1)
    b1 = jax.random.uniform(k2, (1, hidden_size), jnp.float32, -bound1, bound1)
    w2 = jax.random.uniform(k3, (hidden_size, output_size), jnp.float32, -bound2, bound2)
    b2 = jax.random.uniform(k4, (1, output_size), jnp.float32, -bound2, bound2)
    return w1, b1, w2, b2


if __name__ == "__main__":
    # The original module's input/output sizes come from an Excel file; pick
    # small synthetic sizes consistent with the forward pass. hidden_size=93
    # matches the original script. batch=520 (not a multiple of 8) exercises
    # the minimal row-padding path.
    batch = 520
    input_size = 16
    hidden_size = 93
    output_size = 4

    key = jax.random.PRNGKey(0)
    kx, kp = jax.random.split(key)
    x = jax.random.normal(kx, (batch, input_size), jnp.float32)
    w1, b1, w2, b2 = init_params(kp, input_size, hidden_size, output_size)

    # Hidden-dim padding done once, outside the per-call path.
    w1_p, b1_p, w2_p, b2_p = prepare_params(w1, b1, w2, b2)

    out = neural_network_forward(x, w1_p, b1_p, w2_p, b2_p)
    out = jax.block_until_ready(out)

    # Reference check in plain JAX (same math as the PyTorch forward).
    ref = jnp.maximum(x @ w1 + b1, 0.0) @ w2 + b2
    assert out.shape == (batch, output_size)
    assert jnp.allclose(out, ref, atol=1e-4, rtol=1e-4)

    print("KERNEL_OK")
</pallas_src>

<mosaic_0001>
module attributes {stable_mosaic.version = 11 : i64} {
  func.func @mlp_kernel(%arg0: i32, %arg1: memref<520x16xf32, #tpu.memory_space<vmem>>, %arg2: memref<16x128xf32, #tpu.memory_space<vmem>>, %arg3: memref<1x128xf32, #tpu.memory_space<vmem>>, %arg4: memref<128x4xf32, #tpu.memory_space<vmem>>, %arg5: memref<1x4xf32, #tpu.memory_space<vmem>>, %arg6: memref<520x4xf32, #tpu.memory_space<vmem>>) attributes {dimension_semantics = [#tpu.dimension_semantics<parallel>], iteration_bounds = array<i64: 1>, scalar_prefetch = 0 : i64, scratch_operands = 0 : i64, tpu.core_type = #tpu.core_type<tc>, window_params = [{transform_indices = @transform_0, window_bounds = array<i64: 520, 16>}, {pipeline_mode = #tpu.pipeline_mode<synchronous>, transform_indices = @transform_1, window_bounds = array<i64: 16, 128>}, {pipeline_mode = #tpu.pipeline_mode<synchronous>, transform_indices = @transform_2, window_bounds = array<i64: 1, 128>}, {pipeline_mode = #tpu.pipeline_mode<synchronous>, transform_indices = @transform_3, window_bounds = array<i64: 128, 4>}, {pipeline_mode = #tpu.pipeline_mode<synchronous>, transform_indices = @transform_4, window_bounds = array<i64: 1, 4>}, {transform_indices = @transform_5, window_bounds = array<i64: 520, 4>}]} {
    %c0 = arith.constant 0 : index
    %c0_0 = arith.constant 0 : index
    %0 = vector.load %arg1[%c0, %c0_0] : memref<520x16xf32, #tpu.memory_space<vmem>>, vector<520x16xf32>
    %c0_1 = arith.constant 0 : index
    %c0_2 = arith.constant 0 : index
    %1 = vector.load %arg2[%c0_1, %c0_2] : memref<16x128xf32, #tpu.memory_space<vmem>>, vector<16x128xf32>
    %cst = arith.constant dense<0.000000e+00> : vector<520x128xf32>
    %2 = tpu.matmul %0, %1, %cst {dimension_numbers = #tpu.dot_dimension_numbers<[1], [0], [0], [1], [0, 0, 1, 1], [], []>} : vector<520x16xf32>, vector<16x128xf32>, vector<520x128xf32> -> vector<520x128xf32>
    %c0_3 = arith.constant 0 : index
    %c0_4 = arith.constant 0 : index
    %3 = vector.load %arg3[%c0_3, %c0_4] : memref<1x128xf32, #tpu.memory_space<vmem>>, vector<1x128xf32>
    %4 = vector.broadcast %3 : vector<1x128xf32> to vector<520x128xf32>
    %5 = arith.addf %2, %4 : vector<520x128xf32>
    %cst_5 = arith.constant 0.000000e+00 : f32
    %6 = vector.broadcast %cst_5 : f32 to vector<520x128xf32>
    %7 = arith.maximumf %5, %6 : vector<520x128xf32>
    %c0_6 = arith.constant 0 : index
    %c0_7 = arith.constant 0 : index
    %8 = vector.load %arg4[%c0_6, %c0_7] : memref<128x4xf32, #tpu.memory_space<vmem>>, vector<128x4xf32>
    %cst_8 = arith.constant dense<0.000000e+00> : vector<520x4xf32>
    %9 = tpu.matmul %7, %8, %cst_8 {dimension_numbers = #tpu.dot_dimension_numbers<[1], [0], [0], [1], [0, 0, 1, 1], [], []>} : vector<520x128xf32>, vector<128x4xf32>, vector<520x4xf32> -> vector<520x4xf32>
    %c0_9 = arith.constant 0 : index
    %c0_10 = arith.constant 0 : index
    %10 = vector.load %arg5[%c0_9, %c0_10] : memref<1x4xf32, #tpu.memory_space<vmem>>, vector<1x4xf32>
    %11 = vector.broadcast %10 : vector<1x4xf32> to vector<520x4xf32>
    %12 = arith.addf %9, %11 : vector<520x4xf32>
    %c0_11 = arith.constant 0 : index
    %c0_12 = arith.constant 0 : index
    %13 = vector.load %arg6[%c0_11, %c0_12] : memref<520x4xf32, #tpu.memory_space<vmem>>, vector<520x4xf32>
    tpu.vector_store %arg6[%c0_11, %c0_12], %12 {strides = array<i32>} : memref<520x4xf32, #tpu.memory_space<vmem>>, vector<520x4xf32>,
    return
  }
  func.func @transform_0(%arg0: i32) -> (i32, i32) {
    %c0_i32 = arith.constant 0 : i32
    %c0_i32_0 = arith.constant 0 : i32
    return %arg0, %c0_i32 : i32, i32
  }
  func.func @transform_1(%arg0: i32) -> (i32, i32) {
    %c0_i32 = arith.constant 0 : i32
    %c0_i32_0 = arith.constant 0 : i32
    %c0_i32_1 = arith.constant 0 : i32
    return %c0_i32, %c0_i32_0 : i32, i32
  }
  func.func @transform_2(%arg0: i32) -> (i32, i32) {
    %c0_i32 = arith.constant 0 : i32
    %c0_i32_0 = arith.constant 0 : i32
    %c0_i32_1 = arith.constant 0 : i32
    return %c0_i32, %c0_i32_0 : i32, i32
  }
  func.func @transform_3(%arg0: i32) -> (i32, i32) {
    %c0_i32 = arith.constant 0 : i32
    %c0_i32_0 = arith.constant 0 : i32
    %c0_i32_1 = arith.constant 0 : i32
    return %c0_i32, %c0_i32_0 : i32, i32
  }
  func.func @transform_4(%arg0: i32) -> (i32, i32) {
    %c0_i32 = arith.constant 0 : i32
    %c0_i32_0 = arith.constant 0 : i32
    %c0_i32_1 = arith.constant 0 : i32
    return %c0_i32, %c0_i32_0 : i32, i32
  }
  func.func @transform_5(%arg0: i32) -> (i32, i32) {
    %c0_i32 = arith.constant 0 : i32
    %c0_i32_0 = arith.constant 0 : i32
    return %arg0, %c0_i32 : i32, i32
  }
}

</mosaic_0001>

<bundles_post_ra>
// kernel: tpu_custom_call.1
= control target key start
LH: loop header
LB: loop body
LE: loop exit
PB: predicated region body
PF: predicated region fallthrough
CT: control target
= control target key end

     0   :  { %vm91_vm0 = vcmask 130048   ;;  %vm796_vm1 = vcmask 31744   ;;  %s1732_s1 = inlined_call_operand.vmem [shape: f32[16,128], index: 1, kind: input, shape index: {}]   ;;  %s1733_s0 = inlined_call_operand.vmem [shape: f32[520,16], index: 0, kind: input, shape index: {}]   ;;  %s1734_s2 = inlined_call_operand.vmem [shape: f32[1,128], index: 2, kind: input, shape index: {}]   ;;  %s1735_s3 = inlined_call_operand.vmem [shape: f32[128,4], index: 3, kind: input, shape index: {}]   ;;  %s1736_s4 = inlined_call_operand.vmem [shape: f32[1,4], index: 4, kind: input, shape index: {}]   ;;  %s1737_s5 = inlined_call_operand.vmem [shape: f32[520,4], index: 5, kind: output, shape index: {}]  }
   0x1   :  { %v86_v0 = vld [vmem:[%s1732_s1 + $0x8] sm:$0xff]  ;;  %v85_v1 = vld [vmem:[%s1732_s1] sm:$0xff]  ;;  %v22_v4 = vld [vmem:[%s1733_s0 + $0x10] sm:$0xff] }
   0x2   :  { %301 = vmatpush.msra.mxu0 %v86_v0  ;;  %v20_v2 = vld [vmem:[%s1733_s0] sm:$0xff]  ;;  %931 = vmatpush.msra.mxu3 %v86_v0  ;;  %v21_v3 = vld [vmem:[%s1733_s0 + $0x8] sm:$0xff]  ;;  %v23_v5 = vld [vmem:[%s1733_s0 + $0x18] sm:$0xff] }
   0x3   :  { %v24_v6 = vld [vmem:[%s1733_s0 + $0x20] sm:$0xff]  ;;  %v25_v7 = vld [vmem:[%s1733_s0 + $0x28] sm:$0xff]  ;;  %v26_v8 = vld [vmem:[%s1733_s0 + $0x30] sm:$0xff] }
   0x4   :  { %302 = vmatpush.msra.mxu0 %v85_v1  ;;  %932 = vmatpush.msra.mxu3 %v85_v1  ;;  %v27_v9 = vld [vmem:[%s1733_s0 + $0x38] sm:$0xff]  ;;  %v28_v10 = vld [vmem:[%s1733_s0 + $0x40] sm:$0xff]  ;;  %v578_v12 = vld [vmem:[%s1735_s3 + $0x70] sm:$0xff] }
   0x5   :  { %866 = vmatmul.msk.f32.vlgmr.msra.gmra.mxu0 %vm91_vm0, %v20_v2  ;;  %v579_v11 = vld [vmem:[%s1735_s3 + $0x78] sm:$0xff]  ;;  %v577_v13 = vld [vmem:[%s1735_s3 + $0x68] sm:$0xff]  ;;  %v576_v15 = vld [vmem:[%s1735_s3 + $0x60] sm:$0xff] }
   0x6   :  { %584 = vmatpush.msra.mxu1 %v579_v11  ;;  %933 = vmatpush.msra.mxu2 %v579_v11  ;;  %v29_v14 = vld [vmem:[%s1733_s0 + $0x48] sm:$0xff]  ;;  %v575_v16 = vld [vmem:[%s1735_s3 + $0x58] sm:$0xff]  ;;  %v574_v17 = vld [vmem:[%s1735_s3 + $0x50] sm:$0xff] }
   0x7   :  { %934 = vmatpush.msrb.mxu3 %v579_v11  ;;  %v573_v18 = vld [vmem:[%s1735_s3 + $0x48] sm:$0xff]  ;;  %v30_v19 = vld [vmem:[%s1733_s0 + $0x50] sm:$0xff]  ;;  %v572_v20 = vld [vmem:[%s1735_s3 + $0x40] sm:$0xff] }
   0x8   :  { %585 = vmatpush.msra.mxu1 %v578_v12  ;;  %935 = vmatpush.msra.mxu2 %v578_v12  ;;  %v571_v21 = vld [vmem:[%s1735_s3 + $0x38] sm:$0xff]  ;;  %v570_v22 = vld [vmem:[%s1735_s3 + $0x30] sm:$0xff]  ;;  %v569_v23 = vld [vmem:[%s1735_s3 + $0x28] sm:$0xff] }
   0x9   :  { %936 = vmatpush.msrb.mxu3 %v578_v12  ;;  %v31_v24 = vld [vmem:[%s1733_s0 + $0x58] sm:$0xff]  ;;  %v568_v25 = vld [vmem:[%s1735_s3 + $0x20] sm:$0xff]  ;;  %v566_v27 = vld [vmem:[%s1735_s3 + $0x10] sm:$0xff] }
   0xa   :  { %586 = vmatpush.msra.mxu1 %v577_v13  ;;  %937 = vmatpush.msra.mxu2 %v577_v13  ;;  %v567_v26 = vld [vmem:[%s1735_s3 + $0x18] sm:$0xff]  ;;  %v32_v28 = vld [vmem:[%s1733_s0 + $0x60] sm:$0xff]  ;;  %v565_v29 = vld [vmem:[%s1735_s3 + $0x8] sm:$0xff] }
   0xb   :  { %938 = vmatpush.msrb.mxu3 %v577_v13  ;;  %v564_v30 = vld [vmem:[%s1735_s3] sm:$0xff]  ;;  %v33_v31 = vld [vmem:[%s1733_s0 + $0x68] sm:$0xff]  ;;  %v34_v32 = vld [vmem:[%s1733_s0 + $0x70] sm:$0xff] }
   0xc   :  { %587 = vmatpush.msra.mxu1 %v576_v15  ;;  %939 = vmatpush.msra.mxu2 %v576_v15  ;;  %v35_v33 = vld [vmem:[%s1733_s0 + $0x78] sm:$0xff]  ;;  %v1118_v34 = vld [vmem:[%s1734_s2] ss:$0 sm:$0xff]  ;;  %v37_v40 = vld [vmem:[%s1733_s0 + $0x88] sm:$0xff] }
   0xd   :  { %867 = vmatmul.msk.f32.gmra.mxu0 %vm91_vm0, %v21_v3  ;;  %940 = vmatpush.msrb.mxu3 %v576_v15  ;;  %v36_v36 = vld [vmem:[%s1733_s0 + $0x80] sm:$0xff]  ;;  %v38_v44 = vld [vmem:[%s1733_s0 + $0x90] sm:$0xff]  ;;  %v39_v48 = vld [vmem:[%s1733_s0 + $0x98] sm:$0xff] }
   0xe   :  { %588 = vmatpush.msra.mxu1 %v575_v16  ;;  %941 = vmatpush.msra.mxu2 %v575_v16  ;;  %v40_v52 = vld [vmem:[%s1733_s0 + $0xa0] sm:$0xff]  ;;  %v41_v56 = vld [vmem:[%s1733_s0 + $0xa8] sm:$0xff]  ;;  %v42_v60 = vld [vmem:[%s1733_s0 + $0xb0] sm:$0xff] }
   0xf   :  { %942 = vmatpush.msrb.mxu3 %v575_v16  ;;  %v43_v0 = vld [vmem:[%s1733_s0 + $0xb8] sm:$0xff]  ;;  %v46_v12 = vld [vmem:[%s1733_s0 + $0xd0] sm:$0xff] }
  0x10   :  { %589 = vmatpush.msra.mxu1 %v574_v17  ;;  %943 = vmatpush.msra.mxu2 %v574_v17  ;;  %v47_v16 = vld [vmem:[%s1733_s0 + $0xd8] sm:$0xff] }
  0x11   :  { %944 = vmatpush.msrb.mxu3 %v574_v17 }
  0x12   :  { %590 = vmatpush.msra.mxu1 %v573_v18  ;;  %945 = vmatpush.msra.mxu2 %v573_v18 }
  0x13   :  { %946 = vmatpush.msrb.mxu3 %v573_v18 }
  0x14   :  { %591 = vmatpush.msra.mxu1 %v572_v20  ;;  %947 = vmatpush.msra.mxu2 %v572_v20 }
  0x15   :  { %868 = vmatmul.msk.f32.gmra.mxu0 %vm91_vm0, %v22_v4  ;;  %948 = vmatpush.msrb.mxu3 %v572_v20  ;;  %v44_v4 = vld [vmem:[%s1733_s0 + $0xc0] sm:$0xff] }
  0x16   :  { %592 = vmatpush.msra.mxu1 %v571_v21  ;;  %949 = vmatpush.msra.mxu2 %v571_v21 }
  0x17   :  { %950 = vmatpush.msrb.mxu3 %v571_v21  ;;  %v48_v21 = vld [vmem:[%s1733_s0 + $0xe0] sm:$0xff] }
  0x18   :  { %593 = vmatpush.msra.mxu1 %v570_v22  ;;  %951 = vmatpush.msra.mxu2 %v570_v22 }
  0x19   :  { %952 = vmatpush.msrb.mxu3 %v570_v22 }
  0x1a   :  { %594 = vmatpush.msra.mxu1 %v569_v23  ;;  %953 = vmatpush.msra.mxu2 %v569_v23 }
  0x1b   :  { %954 = vmatpush.msrb.mxu3 %v569_v23 }
  0x1c   :  { %595 = vmatpush.msra.mxu1 %v568_v25  ;;  %955 = vmatpush.msra.mxu2 %v568_v25 }
  0x1d   :  { %869 = vmatmul.msk.f32.gmra.mxu0 %vm91_vm0, %v23_v5  ;;  %956 = vmatpush.msrb.mxu3 %v568_v25 }
  0x1e   :  { %596 = vmatpush.msra.mxu1 %v567_v26  ;;  %957 = vmatpush.msra.mxu2 %v567_v26 }
  0x1f   :  { %958 = vmatpush.msrb.mxu3 %v567_v26  ;;  %v49_v26 = vld [vmem:[%s1733_s0 + $0xe8] sm:$0xff] }
  0x20   :  { %597 = vmatpush.msra.mxu1 %v566_v27  ;;  %959 = vmatpush.msra.mxu2 %v566_v27 }
  0x21   :  { %960 = vmatpush.msrb.mxu3 %v566_v27 }
  0x22   :  { %598 = vmatpush.msra.mxu1 %v565_v29  ;;  %961 = vmatpush.msra.mxu2 %v565_v29 }
  0x23   :  { %962 = vmatpush.msrb.mxu3 %v565_v29  ;;  %v57_v29 = vld [vmem:[%s1733_s0 + $0x128] sm:$0xff] }
  0x24   :  { %599 = vmatpush.msra.mxu1 %v564_v30  ;;  %963 = vmatpush.msra.mxu2 %v564_v30 }
  0x25   :  { %870 = vmatmul.msk.f32.gmra.mxu0 %vm91_vm0, %v24_v6  ;;  %964 = vmatpush.msrb.mxu3 %v564_v30 }
  0x2d   :  { %871 = vmatmul.msk.f32.gmra.mxu0 %vm91_vm0, %v25_v7 }
  0x35   :  { %872 = vmatmul.msk.f32.gmra.mxu0 %vm91_vm0, %v26_v8  ;;  %v45_v8 = vld [vmem:[%s1733_s0 + $0xc8] sm:$0xff] }
  0x3d   :  { %873 = vmatmul.msk.f32.gmra.mxu0 %vm91_vm0, %v27_v9 }
  0x45   :  { %874 = vmatmul.msk.f32.gmra.mxu0 %vm91_vm0, %v28_v10 }
  0x4d   :  { %875 = vmatmul.msk.f32.gmra.mxu0 %vm91_vm0, %v29_v14 }
  0x55   :  { %876 = vmatmul.msk.f32.gmra.mxu0 %vm91_vm0, %v30_v19  ;;  %v55_v19 = vld [vmem:[%s1733_s0 + $0x118] sm:$0xff] }
  0x56   :  { %901 = vmatmul.msk.f32.vlgmr.msra.gmra.mxu3 %vm91_vm0, %v55_v19 }
  0x5d   :  { %877 = vmatmul.msk.f32.gmra.mxu0 %vm91_vm0, %v31_v24  ;;  %v56_v24 = vld [vmem:[%s1733_s0 + $0x120] sm:$0xff] }
  0x5e   :  { %902 = vmatmul.msk.f32.gmra.mxu3 %vm91_vm0, %v56_v24 }
  0x65   :  { %878 = vmatmul.msk.f32.gmra.mxu0 %vm91_vm0, %v32_v28 }
  0x66   :  { %903 = vmatmul.msk.f32.gmra.mxu3 %vm91_vm0, %v57_v29 }
  0x6d   :  { %879 = vmatmul.msk.f32.gmra.mxu0 %vm91_vm0, %v33_v31  ;;  %v50_v31 = vld [vmem:[%s1733_s0 + $0xf0] sm:$0xff] }
  0x75   :  { %880 = vmatmul.msk.f32.gmra.mxu0 %vm91_vm0, %v34_v32 }
  0x7d   :  { %881 = vmatmul.msk.f32.gmra.mxu0 %vm91_vm0, %v35_v33 }
  0x82   :  { %v304_v35 = vpop.f32.mrf.mxu0 }
  0x83   :  { %v305_v37 = vadd.f32 %v1118_v34, %v304_v35  ;;  %v58_v35 = vld [vmem:[%s1733_s0 + $0x130] sm:$0xff] }
  0x84   :  { %904 = vmatmul.msk.f32.gmra.mxu3 %vm91_vm0, %v58_v35  ;;  %v68_v35 = vld [vmem:[%s1733_s0 + $0x180] sm:$0xff] }
  0x85   :  { %882 = vmatmul.msk.f32.gmra.mxu0 %vm91_vm0, %v36_v36  ;;  %v499_v38 = vmax.f32 %v305_v37, 0.0  ;;  %v51_v37 = vld [vmem:[%s1733_s0 + $0xf8] sm:$0xff] }
  0x87   :  { %600 = vmatmul.f32.vlgmr.msra.gmra.mxu1 %v499_v38 }
  0x8a   :  { %v307_v39 = vpop.f32.mrf.mxu0 }
  0x8b   :  { %v308_v41 = vadd.f32 %v1118_v34, %v307_v39 }
  0x8d   :  { %883 = vmatmul.msk.f32.gmra.mxu0 %vm91_vm0, %v37_v40  ;;  %v500_v42 = vmax.f32 %v308_v41, 0.0  ;;  %v59_v40 = vld [vmem:[%s1733_s0 + $0x138] sm:$0xff]  ;;  %v1223_v41 = vld [vmem:[%s1736_s4] ss:$0 sm:$0xff] }
  0x8e   :  { %905 = vmatmul.msk.f32.gmra.mxu3 %vm91_vm0, %v59_v40 }
  0x8f   :  { %603 = vmatmul.f32.gmra.mxu1 %v500_v42 }
  0x92   :  { %v310_v43 = vpop.f32.mrf.mxu0 }
  0x93   :  { %v311_v45 = vadd.f32 %v1118_v34, %v310_v43  ;;  %v52_v43 = vld [vmem:[%s1733_s0 + $0x100] sm:$0xff] }
  0x95   :  { %884 = vmatmul.msk.f32.gmra.mxu0 %vm91_vm0, %v38_v44  ;;  %v501_v46 = vmax.f32 %v311_v45, 0.0 }
  0x97   :  { %606 = vmatmul.f32.gmra.mxu1 %v501_v46 }
  0x9a   :  { %v313_v47 = vpop.f32.mrf.mxu0 }
  0x9b   :  { %v314_v49 = vadd.f32 %v1118_v34, %v313_v47 }
  0x9d   :  { %885 = vmatmul.msk.f32.gmra.mxu0 %vm91_vm0, %v39_v48  ;;  %v502_v50 = vmax.f32 %v314_v49, 0.0  ;;  %v60_v48 = vld [vmem:[%s1733_s0 + $0x140] sm:$0xff] }
  0x9e   :  { %906 = vmatmul.msk.f32.gmra.mxu3 %vm91_vm0, %v60_v48  ;;  %v70_v48 = vld [vmem:[%s1733_s0 + $0x190] sm:$0xff] }
  0x9f   :  { %609 = vmatmul.f32.gmra.mxu1 %v502_v50  ;;  %v53_v50 = vld [vmem:[%s1733_s0 + $0x108] sm:$0xff] }
  0xa2   :  { %v316_v51 = vpop.f32.mrf.mxu0 }
  0xa3   :  { %v317_v53 = vadd.f32 %v1118_v34, %v316_v51 }
  0xa5   :  { %886 = vmatmul.msk.f32.gmra.mxu0 %vm91_vm0, %v40_v52  ;;  %v503_v54 = vmax.f32 %v317_v53, 0.0 }
  0xa7   :  { %612 = vmatmul.f32.gmra.mxu1 %v503_v54 }
  0xaa   :  { %v319_v55 = vpop.f32.mrf.mxu0 }
  0xab   :  { %v320_v57 = vadd.f32 %v1118_v34, %v319_v55  ;;  %v61_v55 = vld [vmem:[%s1733_s0 + $0x148] sm:$0xff] }
  0xac   :  { %907 = vmatmul.msk.f32.gmra.mxu3 %vm91_vm0, %v61_v55 }
  0xad   :  { %887 = vmatmul.msk.f32.gmra.mxu0 %vm91_vm0, %v41_v56  ;;  %v504_v58 = vmax.f32 %v320_v57, 0.0  ;;  %v54_v57 = vld [vmem:[%s1733_s0 + $0x110] sm:$0xff] }
  0xaf   :  { %615 = vmatmul.f32.gmra.mxu1 %v504_v58 }
  0xb2   :  { %v322_v59 = vpop.f32.mrf.mxu0 }
  0xb3   :  { %v323_v61 = vadd.f32 %v1118_v34, %v322_v59 }
  0xb5   :  { %888 = vmatmul.msk.f32.gmra.mxu0 %vm91_vm0, %v42_v60  ;;  %v505_v62 = vmax.f32 %v323_v61, 0.0 }
  0xb7   :  { %618 = vmatmul.f32.gmra.mxu1 %v505_v62  ;;  %v62_v62 = vld [vmem:[%s1733_s0 + $0x150] sm:$0xff] }
  0xb8   :  { %908 = vmatmul.msk.f32.gmra.mxu3 %vm91_vm0, %v62_v62 }
  0xba   :  { %v325_v63 = vpop.f32.mrf.mxu0 }
  0xbb   :  { %v326_v1 = vadd.f32 %v1118_v34, %v325_v63 }
  0xbd   :  { %889 = vmatmul.msk.f32.gmra.mxu0 %vm91_vm0, %v43_v0  ;;  %v506_v2 = vmax.f32 %v326_v1, 0.0 }
  0xbf   :  { %621 = vmatmul.f32.gmra.mxu1 %v506_v2 }
  0xc2   :  { %v328_v3 = vpop.f32.mrf.mxu0 }
  0xc3   :  { %v329_v5 = vadd.f32 %v1118_v34, %v328_v3 }
  0xc5   :  { %890 = vmatmul.msk.f32.gmra.mxu0 %vm91_vm0, %v44_v4  ;;  %v507_v6 = vmax.f32 %v329_v5, 0.0  ;;  %v63_v4 = vld [vmem:[%s1733_s0 + $0x158] sm:$0xff] }
  0xc6   :  { %909 = vmatmul.msk.f32.gmra.mxu3 %vm91_vm0, %v63_v4  ;;  %v73_v4 = vld [vmem:[%s1733_s0 + $0x1a8] sm:$0xff] }
  0xc7   :  { %624 = vmatmul.f32.gmra.mxu1 %v507_v6 }
  0xca   :  { %v331_v7 = vpop.f32.mrf.mxu0 }
  0xcb   :  { %v332_v9 = vadd.f32 %v1118_v34, %v331_v7 }
  0xcd   :  { %891 = vmatmul.msk.f32.gmra.mxu0 %vm91_vm0, %v45_v8  ;;  %v508_v10 = vmax.f32 %v332_v9, 0.0 }
  0xcf   :  { %627 = vmatmul.f32.gmra.mxu1 %v508_v10  ;;  %v64_v10 = vld [vmem:[%s1733_s0 + $0x160] sm:$0xff] }
  0xd0   :  { %910 = vmatmul.msk.f32.gmra.mxu3 %vm91_vm0, %v64_v10 }
  0xd2   :  { %v334_v11 = vpop.f32.mrf.mxu0 }
  0xd3   :  { %v335_v13 = vadd.f32 %v1118_v34, %v334_v11 }
  0xd5   :  { %892 = vmatmul.msk.f32.gmra.mxu0 %vm91_vm0, %v46_v12  ;;  %v509_v14 = vmax.f32 %v335_v13, 0.0 }
  0xd7   :  { %630 = vmatmul.f32.gmra.mxu1 %v509_v14 }
  0xda   :  { %v337_v15 = vpop.f32.mrf.mxu0 }
  0xdb   :  { %v338_v17 = vadd.f32 %v1118_v34, %v337_v15 }
  0xdd   :  { %v510_v18 = vmax.f32 %v338_v17, 0.0  ;;  %893 = vmatmul.msk.f32.gmra.mxu0 %vm91_vm0, %v47_v16  ;;  %v65_v16 = vld [vmem:[%s1733_s0 + $0x168] sm:$0xff] }
  0xde   :  { %911 = vmatmul.msk.f32.gmra.mxu3 %vm91_vm0, %v65_v16 }
  0xdf   :  { %633 = vmatmul.f32.gmra.mxu1 %v510_v18 }
  0xe2   :  { %v340_v20 = vpop.f32.mrf.mxu0 }
  0xe3   :  { %v341_v22 = vadd.f32 %v1118_v34, %v340_v20 }
  0xe5   :  { %v511_v23 = vmax.f32 %v341_v22, 0.0  ;;  %894 = vmatmul.msk.f32.gmra.mxu0 %vm91_vm0, %v48_v21  ;;  %v66_v22 = vld [vmem:[%s1733_s0 + $0x170] sm:$0xff] }
  0xe6   :  { %912 = vmatmul.msk.f32.gmra.mxu3 %vm91_vm0, %v66_v22 }
  0xe7   :  { %636 = vmatmul.f32.gmra.mxu1 %v511_v23 }
  0xea   :  { %v343_v25 = vpop.f32.mrf.mxu0 }
  0xeb   :  { %v344_v27 = vadd.f32 %v1118_v34, %v343_v25 }
  0xed   :  { %v512_v28 = vmax.f32 %v344_v27, 0.0  ;;  %895 = vmatmul.msk.f32.gmra.mxu0 %vm91_vm0, %v49_v26 }
  0xef   :  { %639 = vmatmul.f32.gmra.mxu1 %v512_v28  ;;  %v67_v28 = vld [vmem:[%s1733_s0 + $0x178] sm:$0xff] }
  0xf0   :  { %913 = vmatmul.msk.f32.gmra.mxu3 %vm91_vm0, %v67_v28 }
  0xf2   :  { %v346_v30 = vpop.f32.mrf.mxu0 }
  0xf3   :  { %v347_v32 = vadd.f32 %v1118_v34, %v346_v30 }
  0xf5   :  { %v513_v33 = vmax.f32 %v347_v32, 0.0  ;;  %896 = vmatmul.msk.f32.gmra.mxu0 %vm91_vm0, %v50_v31 }
  0xf7   :  { %642 = vmatmul.f32.gmra.mxu1 %v513_v33 }
  0xf8   :  { %914 = vmatmul.msk.f32.gmra.mxu3 %vm91_vm0, %v68_v35 }
  0xfa   :  { %v349_v36 = vpop.f32.mrf.mxu0 }
  0xfb   :  { %v350_v38 = vadd.f32 %v1118_v34, %v349_v36 }
  0xfd   :  { %v514_v39 = vmax.f32 %v350_v38, 0.0  ;;  %897 = vmatmul.msk.f32.gmra.mxu0 %vm91_vm0, %v51_v37 }
  0xff   :  { %645 = vmatmul.f32.gmra.mxu1 %v514_v39 }
 0x102   :  { %v352_v42 = vpop.f32.mrf.mxu0 }
 0x103   :  { %v353_v44 = vadd.f32 %v1118_v34, %v352_v42  ;;  %v69_v42 = vld [vmem:[%s1733_s0 + $0x188] sm:$0xff] }
 0x104   :  { %v601_v45 = vpop.f32.mrf.mxu1  ;;  %915 = vmatmul.msk.f32.gmra.mxu3 %vm91_vm0, %v69_v42 }
 0x105   :  { %v515_v46 = vmax.f32 %v353_v44, 0.0  ;;  %v602_v47 = vadd.f32 %v1223_v41, %v601_v45  ;;  %898 = vmatmul.msk.f32.gmra.mxu0 %vm91_vm0, %v52_v43 }
 0x107   :  { %797 = vst.msk [vmem:[%s1737_s5] sm:$0xff] %vm796_vm1, %v602_v47  ;;  %648 = vmatmul.f32.gmra.mxu1 %v515_v46 }
 0x10a   :  { %v355_v49 = vpop.f32.mrf.mxu0 }
 0x10b   :  { %v356_v51 = vadd.f32 %v1118_v34, %v355_v49 }
 0x10c   :  { %v604_v52 = vpop.f32.mrf.mxu1  ;;  %916 = vmatmul.msk.f32.gmra.mxu3 %vm91_vm0, %v70_v48 }
 0x10d   :  { %v516_v53 = vmax.f32 %v356_v51, 0.0  ;;  %v605_v54 = vadd.f32 %v1223_v41, %v604_v52  ;;  %899 = vmatmul.msk.f32.gmra.mxu0 %vm91_vm0, %v53_v50 }
 0x10f   :  { %798 = vst.msk [vmem:[%s1737_s5 + $0x8] sm:$0xff] %vm796_vm1, %v605_v54  ;;  %651 = vmatmul.f32.gmra.mxu1 %v516_v53  ;;  %v71_v54 = vld [vmem:[%s1733_s0 + $0x198] sm:$0xff] }
 0x112   :  { %v358_v56 = vpop.f32.mrf.mxu0 }
 0x113   :  { %v359_v58 = vadd.f32 %v1118_v34, %v358_v56  ;;  %v1357_v56 = vpop.f32.mrf.mxu3 }
 0x114   :  { %v607_v59 = vpop.f32.mrf.mxu1  ;;  %917 = vmatmul.msk.f32.gmra.mxu3 %vm91_vm0, %v71_v54  ;;  %v410_v42 = vadd.f32 %v1118_v34, %v1357_v56 }
 0x115   :  { %v517_v60 = vmax.f32 %v359_v58, 0.0  ;;  %v608_v61 = vadd.f32 %v1223_v41, %v607_v59  ;;  %900 = vmatmul.msk.f32.gmra.mxu0 %vm91_vm0, %v54_v57 }
 0x117   :  { %799 = vst.msk [vmem:[%s1737_s5 + $0x10] sm:$0xff] %vm796_vm1, %v608_v61  ;;  %654 = vmatmul.f32.gmra.mxu1 %v517_v60  ;;  %v72_v61 = vld [vmem:[%s1733_s0 + $0x1a0] sm:$0xff] }
 0x11a   :  { %v361_v63 = vpop.f32.mrf.mxu0 }
 0x11b   :  { %v362_v0 = vadd.f32 %v1118_v34, %v361_v63  ;;  %v1369_v63 = vpop.f32.mrf.mxu3 }
 0x11c   :  { %v610_v1 = vpop.f32.mrf.mxu1  ;;  %918 = vmatmul.msk.f32.gmra.mxu3 %vm91_vm0, %v72_v61  ;;  %v413_v48 = vadd.f32 %v1118_v34, %v1369_v63 }
 0x11d   :  { %v518_v2 = vmax.f32 %v362_v0, 0.0  ;;  %v611_v3 = vadd.f32 %v1223_v41, %v610_v1 }
 0x11f   :  { %800 = vst.msk [vmem:[%s1737_s5 + $0x18] sm:$0xff] %vm796_vm1, %v611_v3  ;;  %657 = vmatmul.f32.gmra.mxu1 %v518_v2 }
 0x122   :  { %v364_v5 = vpop.f32.mrf.mxu0 }
 0x123   :  { %v365_v6 = vadd.f32 %v1118_v34, %v364_v5 }
 0x124   :  { %v613_v7 = vpop.f32.mrf.mxu1  ;;  %919 = vmatmul.msk.f32.gmra.mxu3 %vm91_vm0, %v73_v4 }
 0x125   :  { %v519_v8 = vmax.f32 %v365_v6, 0.0  ;;  %v614_v9 = vadd.f32 %v1223_v41, %v613_v7  ;;  %v1381_v6 = vpop.f32.mrf.mxu3 }
 0x126   :  { %v416_v54 = vadd.f32 %v1118_v34, %v1381_v6 }
 0x127   :  { %801 = vst.msk [vmem:[%s1737_s5 + $0x20] sm:$0xff] %vm796_vm1, %v614_v9  ;;  %660 = vmatmul.f32.gmra.mxu1 %v519_v8 }
 0x12a   :  { %v367_v11 = vpop.f32.mrf.mxu0 }
 0x12b   :  { %v368_v12 = vadd.f32 %v1118_v34, %v367_v11  ;;  %v74_v11 = vld [vmem:[%s1733_s0 + $0x1b0] sm:$0xff] }
 0x12c   :  { %v616_v13 = vpop.f32.mrf.mxu1  ;;  %920 = vmatmul.msk.f32.gmra.mxu3 %vm91_vm0, %v74_v11 }
 0x12d   :  { %v520_v14 = vmax.f32 %v368_v12, 0.0  ;;  %v617_v15 = vadd.f32 %v1223_v41, %v616_v13  ;;  %v1393_v13 = vpop.f32.mrf.mxu3 }
 0x12f   :  { %802 = vst.msk [vmem:[%s1737_s5 + $0x28] sm:$0xff] %vm796_vm1, %v617_v15  ;;  %663 = vmatmul.f32.gmra.mxu1 %v520_v14 }
 0x132   :  { %v370_v17 = vpop.f32.mrf.mxu0 }
 0x133   :  { %v371_v18 = vadd.f32 %v1118_v34, %v370_v17 }
 0x134   :  { %v619_v19 = vpop.f32.mrf.mxu1 }
 0x135   :  { %v521_v20 = vmax.f32 %v371_v18, 0.0  ;;  %v620_v21 = vadd.f32 %v1223_v41, %v619_v19  ;;  %v75_v18 = vld [vmem:[%s1733_s0 + $0x1b8] sm:$0xff] }
 0x136   :  { %921 = vmatmul.msk.f32.gmra.mxu3 %vm91_vm0, %v75_v18 }
 0x137   :  { %803 = vst.msk [vmem:[%s1737_s5 + $0x30] sm:$0xff] %vm796_vm1, %v620_v21  ;;  %666 = vmatmul.f32.gmra.mxu1 %v521_v20  ;;  %v1405_v20 = vpop.f32.mrf.mxu3 }
 0x13a   :  { %v373_v23 = vpop.f32.mrf.mxu0 }
 0x13b   :  { %v374_v24 = vadd.f32 %v1118_v34, %v373_v23 }
 0x13c   :  { %v622_v25 = vpop.f32.mrf.mxu1 }
 0x13d   :  { %v522_v26 = vmax.f32 %v374_v24, 0.0  ;;  %v623_v27 = vadd.f32 %v1223_v41, %v622_v25  ;;  %v76_v25 = vld [vmem:[%s1733_s0 + $0x1c0] sm:$0xff] }
 0x13e   :  { %922 = vmatmul.msk.f32.gmra.mxu3 %vm91_vm0, %v76_v25 }
 0x13f   :  { %804 = vst.msk [vmem:[%s1737_s5 + $0x38] sm:$0xff] %vm796_vm1, %v623_v27  ;;  %669 = vmatmul.f32.gmra.mxu1 %v522_v26  ;;  %v1417_v27 = vpop.f32.mrf.mxu3 }
 0x142   :  { %v376_v29 = vpop.f32.mrf.mxu0 }
 0x143   :  { %v377_v30 = vadd.f32 %v1118_v34, %v376_v29 }
 0x144   :  { %v625_v31 = vpop.f32.mrf.mxu1 }
 0x145   :  { %v523_v32 = vmax.f32 %v377_v30, 0.0  ;;  %v626_v33 = vadd.f32 %v1223_v41, %v625_v31 }
 0x147   :  { %805 = vst.msk [vmem:[%s1737_s5 + $0x40] sm:$0xff] %vm796_vm1, %v626_v33  ;;  %672 = vmatmul.f32.gmra.mxu1 %v523_v32  ;;  %v77_v32 = vld [vmem:[%s1733_s0 + $0x1c8] sm:$0xff]  ;;  %v1429_v35 = vpop.f32.mrf.mxu3 }
 0x148   :  { %923 = vmatmul.msk.f32.gmra.mxu3 %vm91_vm0, %v77_v32 }
 0x14a   :  { %v379_v36 = vpop.f32.mrf.mxu0 }
 0x14b   :  { %v380_v37 = vadd.f32 %v1118_v34, %v379_v36 }
 0x14c   :  { %v628_v38 = vpop.f32.mrf.mxu1 }
 0x14d   :  { %v524_v39 = vmax.f32 %v380_v37, 0.0  ;;  %v629_v40 = vadd.f32 %v1223_v41, %v628_v38 }
 0x14f   :  { %806 = vst.msk [vmem:[%s1737_s5 + $0x48] sm:$0xff] %vm796_vm1, %v629_v40  ;;  %675 = vmatmul.f32.gmra.mxu1 %v524_v39  ;;  %v78_v40 = vld [vmem:[%s1733_s0 + $0x1d0] sm:$0xff] }
 0x150   :  { %924 = vmatmul.msk.f32.gmra.mxu3 %vm91_vm0, %v78_v40 }
 0x152   :  { %v382_v43 = vpop.f32.mrf.mxu0 }
 0x153   :  { %v383_v44 = vadd.f32 %v1118_v34, %v382_v43  ;;  %v430_v43 = vpop.f32.mrf.mxu3 }
 0x154   :  { %v631_v45 = vpop.f32.mrf.mxu1 }
 0x155   :  { %v525_v46 = vmax.f32 %v383_v44, 0.0  ;;  %v632_v47 = vadd.f32 %v1223_v41, %v631_v45 }
 0x157   :  { %807 = vst.msk [vmem:[%s1737_s5 + $0x50] sm:$0xff] %vm796_vm1, %v632_v47  ;;  %678 = vmatmul.f32.gmra.mxu1 %v525_v46  ;;  %v534_v46 = vmax.f32 %v410_v42, 0.0  ;;  %v79_v47 = vld [vmem:[%s1733_s0 + $0x1d8] sm:$0xff] }
 0x158   :  { %925 = vmatmul.msk.f32.gmra.mxu3 %vm91_vm0, %v79_v47 }
 0x15a   :  { %v385_v49 = vpop.f32.mrf.mxu0 }
 0x15b   :  { %v386_v50 = vadd.f32 %v1118_v34, %v385_v49  ;;  %v433_v49 = vpop.f32.mrf.mxu3 }
 0x15c   :  { %v634_v51 = vpop.f32.mrf.mxu1 }
 0x15d   :  { %v526_v52 = vmax.f32 %v386_v50, 0.0  ;;  %v635_v53 = vadd.f32 %v1223_v41, %v634_v51 }
 0x15f   :  { %808 = vst.msk [vmem:[%s1737_s5 + $0x58] sm:$0xff] %vm796_vm1, %v635_v53  ;;  %681 = vmatmul.f32.gmra.mxu1 %v526_v52  ;;  %v535_v52 = vmax.f32 %v413_v48, 0.0  ;;  %v80_v53 = vld [vmem:[%s1733_s0 + $0x1e0] sm:$0xff] }
 0x160   :  { %926 = vmatmul.msk.f32.gmra.mxu3 %vm91_vm0, %v80_v53 }
 0x162   :  { %v388_v55 = vpop.f32.mrf.mxu0 }
 0x163   :  { %v389_v57 = vadd.f32 %v1118_v34, %v388_v55  ;;  %v436_v55 = vpop.f32.mrf.mxu3 }
 0x164   :  { %v637_v58 = vpop.f32.mrf.mxu1 }
 0x165   :  { %v527_v59 = vmax.f32 %v389_v57, 0.0  ;;  %v638_v60 = vadd.f32 %v1223_v41, %v637_v58  ;;  %v536_v58 = vmax.f32 %v416_v54, 0.0 }
 0x167   :  { %809 = vst.msk [vmem:[%s1737_s5 + $0x60] sm:$0xff] %vm796_vm1, %v638_v60  ;;  %684 = vmatmul.f32.gmra.mxu1 %v527_v59  ;;  %v81_v59 = vld [vmem:[%s1733_s0 + $0x1e8] sm:$0xff]  ;;  %v419_v60 = vadd.f32 %v1118_v34, %v1393_v13  ;;  %v84_v13 = vld [vmem:[%s1733_s0 + $0x200] sm:$0xff] }
 0x168   :  { %927 = vmatmul.msk.f32.gmra.mxu3 %vm91_vm0, %v81_v59 }
 0x16a   :  { %v391_v62 = vpop.f32.mrf.mxu0 }
 0x16b   :  { %v392_v0 = vadd.f32 %v1118_v34, %v391_v62  ;;  %v439_v61 = vpop.f32.mrf.mxu3 }
 0x16c   :  { %v640_v1 = vpop.f32.mrf.mxu1 }
 0x16d   :  { %v528_v2 = vmax.f32 %v392_v0, 0.0  ;;  %v641_v3 = vadd.f32 %v1223_v41, %v640_v1  ;;  %v537_v0 = vmax.f32 %v419_v60, 0.0  ;;  %v82_v1 = vld [vmem:[%s1733_s0 + $0x1f0] sm:$0xff] }
 0x16f   :  { %810 = vst.msk [vmem:[%s1737_s5 + $0x68] sm:$0xff] %vm796_vm1, %v641_v3  ;;  %687 = vmatmul.f32.gmra.mxu1 %v528_v2  ;;  %v422_v2 = vadd.f32 %v1118_v34, %v1405_v20 }
 0x170   :  { %928 = vmatmul.msk.f32.gmra.mxu3 %vm91_vm0, %v82_v1 }
 0x171   :  { %v538_v6 = vmax.f32 %v422_v2, 0.0 }
 0x172   :  { %v394_v5 = vpop.f32.mrf.mxu0 }
 0x173   :  { %v395_v7 = vadd.f32 %v1118_v34, %v394_v5  ;;  %v442_v3 = vpop.f32.mrf.mxu3 }
 0x174   :  { %v643_v8 = vpop.f32.mrf.mxu1  ;;  %v443_v40 = vadd.f32 %v1118_v34, %v442_v3 }
 0x175   :  { %v529_v9 = vmax.f32 %v395_v7, 0.0  ;;  %v644_v10 = vadd.f32 %v1223_v41, %v643_v8  ;;  %v83_v7 = vld [vmem:[%s1733_s0 + $0x1f8] sm:$0xff]  ;;  %v425_v8 = vadd.f32 %v1118_v34, %v1417_v27 }
 0x177   :  { %811 = vst.msk [vmem:[%s1737_s5 + $0x70] sm:$0xff] %vm796_vm1, %v644_v10  ;;  %690 = vmatmul.f32.gmra.mxu1 %v529_v9 }
 0x178   :  { %929 = vmatmul.msk.f32.gmra.mxu3 %vm91_vm0, %v83_v7 }
 0x17a   :  { %v397_v12 = vpop.f32.mrf.mxu0 }
 0x17b   :  { %v398_v14 = vadd.f32 %v1118_v34, %v397_v12  ;;  %v445_v9 = vpop.f32.mrf.mxu3  ;;  %v539_v12 = vmax.f32 %v425_v8, 0.0 }
 0x17c   :  { %v646_v15 = vpop.f32.mrf.mxu1 }
 0x17d   :  { %v530_v16 = vmax.f32 %v398_v14, 0.0  ;;  %v647_v17 = vadd.f32 %v1223_v41, %v646_v15  ;;  %v428_v14 = vadd.f32 %v1118_v34, %v1429_v35  ;;  %v440_v35 = vadd.f32 %v1118_v34, %v439_v61 }
 0x17f   :  { %812 = vst.msk [vmem:[%s1737_s5 + $0x78] sm:$0xff] %vm796_vm1, %v647_v17  ;;  %693 = vmatmul.f32.vlgmr.msra.gmra.mxu2 %v530_v16  ;;  %v540_v18 = vmax.f32 %v428_v14, 0.0 }
 0x180   :  { %930 = vmatmul.msk.f32.gmra.mxu3 %vm91_vm0, %v84_v13 }
 0x182   :  { %v400_v19 = vpop.f32.mrf.mxu0 }
 0x183   :  { %v401_v21 = vadd.f32 %v1118_v34, %v400_v19  ;;  %v448_v15 = vpop.f32.mrf.mxu3  ;;  %v431_v19 = vadd.f32 %v1118_v34, %v430_v43 }
 0x184   :  { %v649_v22 = vpop.f32.mrf.mxu1 }
 0x185   :  { %v531_v23 = vmax.f32 %v401_v21, 0.0  ;;  %v650_v24 = vadd.f32 %v1223_v41, %v649_v22 }
 0x187   :  { %813 = vst.msk [vmem:[%s1737_s5 + $0x80] sm:$0xff] %vm796_vm1, %v650_v24  ;;  %696 = vmatmul.f32.gmra.mxu2 %v531_v23  ;;  %v541_v23 = vmax.f32 %v431_v19, 0.0  ;;  %v434_v24 = vadd.f32 %v1118_v34, %v433_v49  ;;  %v449_v49 = vadd.f32 %v1118_v34, %v448_v15 }
 0x189   :  { %v547_v53 = vmax.f32 %v449_v49, 0.0 }
 0x18a   :  { %v403_v26 = vpop.f32.mrf.mxu0 }
 0x18b   :  { %v404_v28 = vadd.f32 %v1118_v34, %v403_v26  ;;  %v451_v20 = vpop.f32.mrf.mxu3 }
 0x18c   :  { %v652_v29 = vpop.f32.mrf.mxu1  ;;  %v452_v54 = vadd.f32 %v1118_v34, %v451_v20 }
 0x18d   :  { %v532_v30 = vmax.f32 %v404_v28, 0.0  ;;  %v653_v31 = vadd.f32 %v1223_v41, %v652_v29  ;;  %v542_v28 = vmax.f32 %v434_v24, 0.0  ;;  %v437_v29 = vadd.f32 %v1118_v34, %v436_v55 }
 0x18f   :  { %814 = vst.msk [vmem:[%s1737_s5 + $0x88] sm:$0xff] %vm796_vm1, %v653_v31  ;;  %699 = vmatmul.f32.gmra.mxu2 %v532_v30  ;;  %v543_v32 = vmax.f32 %v437_v29, 0.0 }
 0x192   :  { %v406_v33 = vpop.f32.mrf.mxu0 }
 0x193   :  { %v407_v36 = vadd.f32 %v1118_v34, %v406_v33  ;;  %v454_v25 = vpop.f32.mrf.mxu3 }
 0x194   :  { %v655_v37 = vpop.f32.mrf.mxu1  ;;  %v455_v59 = vadd.f32 %v1118_v34, %v454_v25 }
 0x195   :  { %v533_v38 = vmax.f32 %v407_v36, 0.0  ;;  %v656_v39 = vadd.f32 %v1223_v41, %v655_v37 }
 0x197   :  { %815 = vst.msk [vmem:[%s1737_s5 + $0x90] sm:$0xff] %vm796_vm1, %v656_v39  ;;  %702 = vmatmul.f32.gmra.mxu2 %v533_v38  ;;  %v544_v38 = vmax.f32 %v440_v35, 0.0 }
 0x19b   :  { %v457_v30 = vpop.f32.mrf.mxu3 }
 0x19c   :  { %v658_v44 = vpop.f32.mrf.mxu1 }
 0x19d   :  { %v659_v45 = vadd.f32 %v1223_v41, %v658_v44  ;;  %v545_v44 = vmax.f32 %v443_v40, 0.0 }
 0x19f   :  { %816 = vst.msk [vmem:[%s1737_s5 + $0x98] sm:$0xff] %vm796_vm1, %v659_v45  ;;  %705 = vmatmul.f32.gmra.mxu2 %v534_v46  ;;  %v446_v46 = vadd.f32 %v1118_v34, %v445_v9 }
 0x1a1   :  { %v546_v48 = vmax.f32 %v446_v46, 0.0 }
 0x1a3   :  { %v460_v36 = vpop.f32.mrf.mxu3 }
 0x1a4   :  { %v661_v50 = vpop.f32.mrf.mxu1 }
 0x1a5   :  { %v662_v51 = vadd.f32 %v1223_v41, %v661_v50 }
 0x1a7   :  { %817 = vst.msk [vmem:[%s1737_s5 + $0xa0] sm:$0xff] %vm796_vm1, %v662_v51  ;;  %708 = vmatmul.f32.gmra.mxu2 %v535_v52 }
 0x1ab   :  { %v463_v42 = vpop.f32.mrf.mxu3 }
 0x1ac   :  { %v664_v56 = vpop.f32.mrf.mxu1 }
 0x1ad   :  { %v665_v57 = vadd.f32 %v1223_v41, %v664_v56 }
 0x1af   :  { %818 = vst.msk [vmem:[%s1737_s5 + $0xa8] sm:$0xff] %vm796_vm1, %v665_v57  ;;  %711 = vmatmul.f32.gmra.mxu2 %v536_v58  ;;  %v548_v58 = vmax.f32 %v452_v54, 0.0 }
 0x1b3   :  { %v466_v47 = vpop.f32.mrf.mxu3 }
 0x1b4   :  { %v667_v62 = vpop.f32.mrf.mxu1  ;;  %v467_v15 = vadd.f32 %v1118_v34, %v466_v47 }
 0x1b5   :  { %v668_v63 = vadd.f32 %v1223_v41, %v667_v62 }
 0x1b6   :  { %v553_v19 = vmax.f32 %v467_v15, 0.0 }
 0x1b7   :  { %819 = vst.msk [vmem:[%s1737_s5 + $0xb0] sm:$0xff] %vm796_vm1, %v668_v63  ;;  %714 = vmatmul.f32.gmra.mxu2 %v537_v0  ;;  %v549_v63 = vmax.f32 %v455_v59, 0.0  ;;  %v458_v0 = vadd.f32 %v1118_v34, %v457_v30 }
 0x1bb   :  { %v469_v51 = vpop.f32.mrf.mxu3 }
 0x1bc   :  { %v670_v4 = vpop.f32.mrf.mxu1  ;;  %v470_v20 = vadd.f32 %v1118_v34, %v469_v51 }
 0x1bd   :  { %v671_v5 = vadd.f32 %v1223_v41, %v670_v4  ;;  %v550_v4 = vmax.f32 %v458_v0, 0.0 }
 0x1be   :  { %v554_v25 = vmax.f32 %v470_v20, 0.0 }
 0x1bf   :  { %820 = vst.msk [vmem:[%s1737_s5 + $0xb8] sm:$0xff] %vm796_vm1, %v671_v5  ;;  %717 = vmatmul.f32.gmra.mxu2 %v538_v6  ;;  %v461_v5 = vadd.f32 %v1118_v34, %v460_v36 }
 0x1c1   :  { %v551_v9 = vmax.f32 %v461_v5, 0.0 }
 0x1c3   :  { %v472_v56 = vpop.f32.mrf.mxu3 }
 0x1c4   :  { %v673_v10 = vpop.f32.mrf.mxu1 }
 0x1c5   :  { %v674_v11 = vadd.f32 %v1223_v41, %v673_v10  ;;  %v464_v10 = vadd.f32 %v1118_v34, %v463_v42 }
 0x1c7   :  { %821 = vst.msk [vmem:[%s1737_s5 + $0xc0] sm:$0xff] %vm796_vm1, %v674_v11  ;;  %720 = vmatmul.f32.gmra.mxu2 %v539_v12  ;;  %v552_v14 = vmax.f32 %v464_v10, 0.0 }
 0x1cb   :  { %v475_v61 = vpop.f32.mrf.mxu3 }
 0x1cc   :  { %v676_v16 = vpop.f32.mrf.mxu1  ;;  %v476_v35 = vadd.f32 %v1118_v34, %v475_v61 }
 0x1cd   :  { %v677_v17 = vadd.f32 %v1223_v41, %v676_v16 }
 0x1ce   :  { %v556_v40 = vmax.f32 %v476_v35, 0.0 }
 0x1cf   :  { %822 = vst.msk [vmem:[%s1737_s5 + $0xc8] sm:$0xff] %vm796_vm1, %v677_v17  ;;  %723 = vmatmul.f32.gmra.mxu2 %v540_v18 }
 0x1d3   :  { %v478_v2 = vpop.f32.mrf.mxu3 }
 0x1d4   :  { %v679_v21 = vpop.f32.mrf.mxu1 }
 0x1d5   :  { %v680_v22 = vadd.f32 %v1223_v41, %v679_v21 }
 0x1d7   :  { %823 = vst.msk [vmem:[%s1737_s5 + $0xd0] sm:$0xff] %vm796_vm1, %v680_v22  ;;  %726 = vmatmul.f32.gmra.mxu2 %v541_v23 }
 0x1db   :  { %v481_v7 = vpop.f32.mrf.mxu3 }
 0x1dc   :  { %v682_v26 = vpop.f32.mrf.mxu1  ;;  %v482_v47 = vadd.f32 %v1118_v34, %v481_v7 }
 0x1dd   :  { %v683_v27 = vadd.f32 %v1223_v41, %v682_v26 }
 0x1df   :  { %824 = vst.msk [vmem:[%s1737_s5 + $0xd8] sm:$0xff] %vm796_vm1, %v683_v27  ;;  %729 = vmatmul.f32.gmra.mxu2 %v542_v28  ;;  %v473_v27 = vadd.f32 %v1118_v34, %v472_v56 }
 0x1e3   :  { %v484_v12 = vpop.f32.mrf.mxu3 }
 0x1e4   :  { %v685_v31 = vpop.f32.mrf.mxu1  ;;  %v485_v51 = vadd.f32 %v1118_v34, %v484_v12 }
 0x1e5   :  { %v686_v33 = vadd.f32 %v1223_v41, %v685_v31 }
 0x1e6   :  { %v559_v54 = vmax.f32 %v485_v51, 0.0 }
 0x1e7   :  { %825 = vst.msk [vmem:[%s1737_s5 + $0xe0] sm:$0xff] %vm796_vm1, %v686_v33  ;;  %732 = vmatmul.f32.gmra.mxu2 %v543_v32  ;;  %v555_v32 = vmax.f32 %v473_v27, 0.0 }
 0x1eb   :  { %v487_v17 = vpop.f32.mrf.mxu3 }
 0x1ec   :  { %v688_v37 = vpop.f32.mrf.mxu1 }
 0x1ed   :  { %v689_v39 = vadd.f32 %v1223_v41, %v688_v37 }
 0x1ef   :  { %826 = vst.msk [vmem:[%s1737_s5 + $0xe8] sm:$0xff] %vm796_vm1, %v689_v39  ;;  %735 = vmatmul.f32.gmra.mxu2 %v544_v38 }
 0x1f3   :  { %v490_v22 = vpop.f32.mrf.mxu3 }
 0x1f4   :  { %v691_v43 = vpop.f32.mrf.mxu1  ;;  %v491_v24 = vadd.f32 %v1118_v34, %v490_v22 }
 0x1f5   :  { %v692_v45 = vadd.f32 %v1223_v41, %v691_v43  ;;  %v479_v43 = vadd.f32 %v1118_v34, %v478_v2 }
 0x1f6   :  { %v561_v26 = vmax.f32 %v491_v24, 0.0 }
 0x1f7   :  { %827 = vst.msk [vmem:[%s1737_s5 + $0xf0] sm:$0xff] %vm796_vm1, %v692_v45  ;;  %738 = vmatmul.f32.gmra.mxu2 %v545_v44  ;;  %v557_v46 = vmax.f32 %v479_v43, 0.0 }
 0x1f8   :  { %786 = vmatmul.f32.vlgmr.msrb.gmra.mxu3 %v561_v26 }
 0x1fb   :  { %v493_v29 = vpop.f32.mrf.mxu3 }
 0x1fc   :  { %v494_v31 = vadd.f32 %v1118_v34, %v493_v29 }
 0x1fe   :  { %v562_v33 = vmax.f32 %v494_v31, 0.0 }
 0x1ff   :  { %741 = vmatmul.f32.gmra.mxu2 %v546_v48 }
 0x200   :  { %789 = vmatmul.f32.gmra.mxu3 %v562_v33 }
 0x202   :  { %v694_v50 = vpop.f32.mrf.mxu2 }
 0x203   :  { %v695_v52 = vadd.f32 %v1223_v41, %v694_v50  ;;  %v496_v37 = vpop.f32.mrf.mxu3  ;;  %v558_v50 = vmax.f32 %v482_v47, 0.0 }
 0x204   :  { %v497_v39 = vadd.f32 %v1118_v34, %v496_v37 }
 0x205   :  { %828 = vst.msk [vmem:[%s1737_s5 + $0xf8] sm:$0xff] %vm796_vm1, %v695_v52 }
 0x206   :  { %v563_v42 = vmax.f32 %v497_v39, 0.0 }
 0x207   :  { %744 = vmatmul.f32.gmra.mxu2 %v547_v53 }
 0x208   :  { %792 = vmatmul.f32.gmra.mxu3 %v563_v42 }
 0x20a   :  { %v697_v55 = vpop.f32.mrf.mxu2 }
 0x20b   :  { %v698_v57 = vadd.f32 %v1223_v41, %v697_v55  ;;  %v488_v55 = vadd.f32 %v1118_v34, %v487_v17 }
 0x20d   :  { %829 = vst.msk [vmem:[%s1737_s5 + $0x100] sm:$0xff] %vm796_vm1, %v698_v57 }
 0x20f   :  { %747 = vmatmul.f32.gmra.mxu2 %v548_v58  ;;  %v560_v58 = vmax.f32 %v488_v55, 0.0 }
 0x212   :  { %v700_v60 = vpop.f32.mrf.mxu2 }
 0x213   :  { %v701_v62 = vadd.f32 %v1223_v41, %v700_v60 }
 0x215   :  { %830 = vst.msk [vmem:[%s1737_s5 + $0x108] sm:$0xff] %vm796_vm1, %v701_v62 }
 0x217   :  { %750 = vmatmul.f32.gmra.mxu2 %v549_v63 }
 0x21a   :  { %v703_v1 = vpop.f32.mrf.mxu2 }
 0x21b   :  { %v704_v3 = vadd.f32 %v1223_v41, %v703_v1 }
 0x21d   :  { %831 = vst.msk [vmem:[%s1737_s5 + $0x110] sm:$0xff] %vm796_vm1, %v704_v3 }
 0x21f   :  { %753 = vmatmul.f32.gmra.mxu2 %v550_v4 }
 0x222   :  { %v706_v6 = vpop.f32.mrf.mxu2 }
 0x223   :  { %v707_v8 = vadd.f32 %v1223_v41, %v706_v6 }
 0x225   :  { %832 = vst.msk [vmem:[%s1737_s5 + $0x118] sm:$0xff] %vm796_vm1, %v707_v8 }
 0x227   :  { %756 = vmatmul.f32.gmra.mxu2 %v551_v9 }
 0x22a   :  { %v709_v11 = vpop.f32.mrf.mxu2 }
 0x22b   :  { %v710_v13 = vadd.f32 %v1223_v41, %v709_v11 }
 0x22d   :  { %833 = vst.msk [vmem:[%s1737_s5 + $0x120] sm:$0xff] %vm796_vm1, %v710_v13 }
 0x22f   :  { %759 = vmatmul.f32.gmra.mxu2 %v552_v14 }
 0x232   :  { %v712_v16 = vpop.f32.mrf.mxu2 }
 0x233   :  { %v713_v18 = vadd.f32 %v1223_v41, %v712_v16 }
 0x235   :  { %834 = vst.msk [vmem:[%s1737_s5 + $0x128] sm:$0xff] %vm796_vm1, %v713_v18 }
 0x237   :  { %762 = vmatmul.f32.gmra.mxu2 %v553_v19 }
 0x23a   :  { %v715_v21 = vpop.f32.mrf.mxu2 }
 0x23b   :  { %v716_v23 = vadd.f32 %v1223_v41, %v715_v21 }
 0x23d   :  { %835 = vst.msk [vmem:[%s1737_s5 + $0x130] sm:$0xff] %vm796_vm1, %v716_v23 }
 0x23f   :  { %765 = vmatmul.f32.gmra.mxu2 %v554_v25 }
 0x242   :  { %v718_v28 = vpop.f32.mrf.mxu2 }
 0x243   :  { %v719_v30 = vadd.f32 %v1223_v41, %v718_v28 }
 0x245   :  { %836 = vst.msk [vmem:[%s1737_s5 + $0x138] sm:$0xff] %vm796_vm1, %v719_v30 }
 0x247   :  { %768 = vmatmul.f32.gmra.mxu2 %v555_v32 }
 0x24a   :  { %v721_v36 = vpop.f32.mrf.mxu2 }
 0x24b   :  { %v722_v38 = vadd.f32 %v1223_v41, %v721_v36 }
 0x24d   :  { %837 = vst.msk [vmem:[%s1737_s5 + $0x140] sm:$0xff] %vm796_vm1, %v722_v38 }
 0x24f   :  { %771 = vmatmul.f32.gmra.mxu2 %v556_v40 }
 0x252   :  { %v724_v44 = vpop.f32.mrf.mxu2 }
 0x253   :  { %v725_v45 = vadd.f32 %v1223_v41, %v724_v44 }
 0x255   :  { %838 = vst.msk [vmem:[%s1737_s5 + $0x148] sm:$0xff] %vm796_vm1, %v725_v45 }
 0x257   :  { %774 = vmatmul.f32.gmra.mxu2 %v557_v46 }
 0x25a   :  { %v727_v48 = vpop.f32.mrf.mxu2 }
 0x25b   :  { %v728_v49 = vadd.f32 %v1223_v41, %v727_v48 }
 0x25d   :  { %839 = vst.msk [vmem:[%s1737_s5 + $0x150] sm:$0xff] %vm796_vm1, %v728_v49 }
 0x25f   :  { %777 = vmatmul.f32.gmra.mxu2 %v558_v50 }
 0x262   :  { %v730_v52 = vpop.f32.mrf.mxu2 }
 0x263   :  { %v731_v53 = vadd.f32 %v1223_v41, %v730_v52 }
 0x265   :  { %840 = vst.msk [vmem:[%s1737_s5 + $0x158] sm:$0xff] %vm796_vm1, %v731_v53 }
 0x267   :  { %780 = vmatmul.f32.gmra.mxu2 %v559_v54 }
 0x26a   :  { %v733_v56 = vpop.f32.mrf.mxu2 }
 0x26b   :  { %v734_v57 = vadd.f32 %v1223_v41, %v733_v56 }
 0x26d   :  { %841 = vst.msk [vmem:[%s1737_s5 + $0x160] sm:$0xff] %vm796_vm1, %v734_v57 }
 0x26f   :  { %783 = vmatmul.f32.gmra.mxu2 %v560_v58 }
 0x272   :  { %v736_v59 = vpop.f32.mrf.mxu2 }
 0x273   :  { %v737_v60 = vadd.f32 %v1223_v41, %v736_v59 }
 0x275   :  { %842 = vst.msk [vmem:[%s1737_s5 + $0x168] sm:$0xff] %vm796_vm1, %v737_v60 }
 0x27a   :  { %v739_v61 = vpop.f32.mrf.mxu2 }
 0x27b   :  { %v740_v34 = vadd.f32 %v1223_v41, %v739_v61  ;;  %v787_v15 = vpop.f32.mrf.mxu3 }
 0x27c   :  { %v788_v17 = vadd.f32 %v1223_v41, %v787_v15 }
 0x27d   :  { %843 = vst.msk [vmem:[%s1737_s5 + $0x170] sm:$0xff] %vm796_vm1, %v740_v34 }
 0x27e   :  { %859 = vst.msk [vmem:[%s1737_s5 + $0x1f0] sm:$0xff] %vm796_vm1, %v788_v17 }
 0x282   :  { %v742_v62 = vpop.f32.mrf.mxu2 }
 0x283   :  { %v743_v63 = vadd.f32 %v1223_v41, %v742_v62  ;;  %v790_v19 = vpop.f32.mrf.mxu3 }
 0x284   :  { %v791_v21 = vadd.f32 %v1223_v41, %v790_v19 }
 0x285   :  { %844 = vst.msk [vmem:[%s1737_s5 + $0x178] sm:$0xff] %vm796_vm1, %v743_v63 }
 0x286   :  { %860 = vst.msk [vmem:[%s1737_s5 + $0x1f8] sm:$0xff] %vm796_vm1, %v791_v21 }
 0x28a   :  { %v745_v0 = vpop.f32.mrf.mxu2 }
 0x28b   :  { %v746_v1 = vadd.f32 %v1223_v41, %v745_v0  ;;  %v793_v23 = vpop.f32.mrf.mxu3 }
 0x28c   :  { %v794_v25 = vadd.f32 %v1223_v41, %v793_v23 }
 0x28d   :  { %845 = vst.msk [vmem:[%s1737_s5 + $0x180] sm:$0xff] %vm796_vm1, %v746_v1 }
 0x28e   :  { %861 = vst.msk [vmem:[%s1737_s5 + $0x200] sm:$0xff] %vm796_vm1, %v794_v25 }
 0x292   :  { %v748_v2 = vpop.f32.mrf.mxu2 }
 0x293   :  { %v749_v3 = vadd.f32 %v1223_v41, %v748_v2 }
 0x295   :  { %846 = vst.msk [vmem:[%s1737_s5 + $0x188] sm:$0xff] %vm796_vm1, %v749_v3 }
 0x29a   :  { %v751_v4 = vpop.f32.mrf.mxu2 }
 0x29b   :  { %v752_v5 = vadd.f32 %v1223_v41, %v751_v4 }
 0x29d   :  { %847 = vst.msk [vmem:[%s1737_s5 + $0x190] sm:$0xff] %vm796_vm1, %v752_v5 }
 0x2a2   :  { %v754_v6 = vpop.f32.mrf.mxu2 }
 0x2a3   :  { %v755_v7 = vadd.f32 %v1223_v41, %v754_v6 }
 0x2a5   :  { %848 = vst.msk [vmem:[%s1737_s5 + $0x198] sm:$0xff] %vm796_vm1, %v755_v7 }
 0x2aa   :  { %v757_v8 = vpop.f32.mrf.mxu2 }
 0x2ab   :  { %v758_v9 = vadd.f32 %v1223_v41, %v757_v8 }
 0x2ad   :  { %849 = vst.msk [vmem:[%s1737_s5 + $0x1a0] sm:$0xff] %vm796_vm1, %v758_v9 }
 0x2b2   :  { %v760_v10 = vpop.f32.mrf.mxu2 }
 0x2b3   :  { %v761_v11 = vadd.f32 %v1223_v41, %v760_v10 }
 0x2b5   :  { %850 = vst.msk [vmem:[%s1737_s5 + $0x1a8] sm:$0xff] %vm796_vm1, %v761_v11 }
 0x2ba   :  { %v763_v12 = vpop.f32.mrf.mxu2 }
 0x2bb   :  { %v764_v13 = vadd.f32 %v1223_v41, %v763_v12 }
 0x2bd   :  { %851 = vst.msk [vmem:[%s1737_s5 + $0x1b0] sm:$0xff] %vm796_vm1, %v764_v13 }
 0x2c2   :  { %v766_v14 = vpop.f32.mrf.mxu2 }
 0x2c3   :  { %v767_v16 = vadd.f32 %v1223_v41, %v766_v14 }
 0x2c5   :  { %852 = vst.msk [vmem:[%s1737_s5 + $0x1b8] sm:$0xff] %vm796_vm1, %v767_v16 }
 0x2ca   :  { %v769_v18 = vpop.f32.mrf.mxu2 }
 0x2cb   :  { %v770_v20 = vadd.f32 %v1223_v41, %v769_v18 }
 0x2cd   :  { %853 = vst.msk [vmem:[%s1737_s5 + $0x1c0] sm:$0xff] %vm796_vm1, %v770_v20 }
 0x2d2   :  { %v772_v22 = vpop.f32.mrf.mxu2 }
 0x2d3   :  { %v773_v24 = vadd.f32 %v1223_v41, %v772_v22 }
 0x2d5   :  { %854 = vst.msk [vmem:[%s1737_s5 + $0x1c8] sm:$0xff] %vm796_vm1, %v773_v24 }
 0x2da   :  { %v775_v26 = vpop.f32.mrf.mxu2 }
 0x2db   :  { %v776_v27 = vadd.f32 %v1223_v41, %v775_v26 }
 0x2dd   :  { %855 = vst.msk [vmem:[%s1737_s5 + $0x1d0] sm:$0xff] %vm796_vm1, %v776_v27 }
 0x2e2   :  { %v778_v28 = vpop.f32.mrf.mxu2 }
 0x2e3   :  { %v779_v29 = vadd.f32 %v1223_v41, %v778_v28 }
 0x2e5   :  { %856 = vst.msk [vmem:[%s1737_s5 + $0x1d8] sm:$0xff] %vm796_vm1, %v779_v29 }
 0x2ea   :  { %v781_v30 = vpop.f32.mrf.mxu2 }
 0x2eb   :  { %v782_v31 = vadd.f32 %v1223_v41, %v781_v30 }
 0x2ed   :  { %857 = vst.msk [vmem:[%s1737_s5 + $0x1e0] sm:$0xff] %vm796_vm1, %v782_v31 }
 0x2f2   :  { %v784_v32 = vpop.f32.mrf.mxu2 }
 0x2f3   :  { %v785_v33 = vadd.f32 %v1223_v41, %v784_v32 }
 0x2f5   :  { %858 = vst.msk [vmem:[%s1737_s5 + $0x1e8] sm:$0xff] %vm796_vm1, %v785_v33 }

</bundles_post_ra>
